<compile_context>
chip_gen: v6e
topology: v6e:2x2x1
jax: 0.10.0
libtpu: 0.0.40
codegen_flags: <defaults>
</compile_context>

<pallas_src>
import jax
import jax.numpy as jnp
from jax.experimental import pallas as pl
from jax.experimental.pallas import tpu as pltpu


# ----------------------------- fused Pallas kernel ---------------------------

def _vae_fused_kernel(x_ref, eps_ref, sp_ref, sn_ref, ew_ref, eb_ref,
                      mvw_ref, mvb_ref, dw_ref, db_ref, out_ref, kl_ref):
    """One batch element per grid step; channels-last everywhere.

    x_ref   : (1, T, Cin) f32      eps_ref : (1, T, H)  f32
    sp_ref  : (T, T)      bf16     sn_ref  : (T, T)     bf16   (shift matrices)
    ew_ref  : (3, Cin, H) bf16     eb_ref  : (1, H)     f32
    mvw_ref : (H, 2H)     bf16     mvb_ref : (1, 2H)    f32    (fused mean|var)
    dw_ref  : (3, H, Cin) bf16     db_ref  : (1, Cin)   f32
    out_ref : (1, T, Cin) f32      kl_ref  : (1, 1, 1)  f32
    """
    f32 = jnp.float32
    bf16 = jnp.bfloat16
    H = eps_ref.shape[2]

    sp = sp_ref[...]   # (S_prev @ x)[t] = x[t-1], zero at t=0
    sn = sn_ref[...]   # (S_next @ x)[t] = x[t+1], zero at t=T-1

    def conv3(inp_bf, w_ref, b_ref):
        """Conv1d(kernel=3, stride=1, pad=1), channels-last, 3 shifted matmuls."""
        prev = jnp.dot(sp, inp_bf, preferred_element_type=f32).astype(bf16)
        nxt = jnp.dot(sn, inp_bf, preferred_element_type=f32).astype(bf16)
        acc = (jnp.dot(prev, w_ref[0], preferred_element_type=f32)
               + jnp.dot(inp_bf, w_ref[1], preferred_element_type=f32)
               + jnp.dot(nxt, w_ref[2], preferred_element_type=f32))
        return acc + b_ref[...]

    # Encoder: Conv1d(c_in -> hid, k=3, pad=1) + ReLU.
    x_bf = x_ref[0].astype(bf16)                                   # (T, Cin)
    lat = jnp.maximum(conv3(x_bf, ew_ref, eb_ref), 0.0)            # (T, H) f32
    lat_bf = lat.astype(bf16)

    # Fused mean / var heads: one (T,H)@(H,2H) matmul, then lane-split.
    mv = jnp.dot(lat_bf, mvw_ref[...], preferred_element_type=f32) + mvb_ref[...]
    mean = mv[:, :H]                                               # (T, H)
    var = mv[:, H:]                                                # (T, H)

    # Reparameterization + per-batch KL partial sum.
    s = jnp.exp(0.5 * var)
    z = mean + s * eps_ref[0]
    kl_terms = 1.0 + var - mean * mean - s * s                     # exp(var) == s*s
    kl_ref[0] = jnp.sum(kl_terms).reshape(1, 1)

    # Decoder: Conv1d(hid -> c_in, k=3, pad=1).
    out = conv3(z.astype(bf16), dw_ref, db_ref)                    # (T, Cin) f32
    out_ref[0] = out.astype(out_ref.dtype)


def _fused_forward(x_tc, eps_tc, sp, sn, ew, eb, mvw, mvb, dw, db):
    B, T, Cin = x_tc.shape
    H = eps_tc.shape[-1]

    def full(shape):
        nd = len(shape)
        return pl.BlockSpec(shape, lambda b, _n=nd: (0,) * _n)

    return pl.pallas_call(
        _vae_fused_kernel,
        out_shape=(
            jax.ShapeDtypeStruct((B, T, Cin), jnp.float32),   # out (channels-last)
            jax.ShapeDtypeStruct((B, 1, 1), jnp.float32),     # per-batch KL partial
        ),
        grid=(B,),
        in_specs=[
            pl.BlockSpec((1, T, Cin), lambda b: (b, 0, 0)),   # x
            pl.BlockSpec((1, T, H), lambda b: (b, 0, 0)),     # eps
            full((T, T)), full((T, T)),                       # shift matrices
            full((3, Cin, H)), full((1, H)),                  # enc weight taps / bias
            full((H, 2 * H)), full((1, 2 * H)),               # fused mean|var weight / bias
            full((3, H, Cin)), full((1, Cin)),                # dec weight taps / bias
        ],
        out_specs=(
            pl.BlockSpec((1, T, Cin), lambda b: (b, 0, 0)),
            pl.BlockSpec((1, 1, 1), lambda b: (b, 0, 0)),
        ),
        compiler_params=pltpu.CompilerParams(
            dimension_semantics=("parallel",)),
    )(x_tc, eps_tc, sp, sn, ew, eb, mvw, mvb, dw, db)


# ------------------------------ model wrapper --------------------------------

@jax.jit
def model_forward(params, x, eps):
    """x: (B, c_in, T) NCT, eps: (B, hid, T) NCT -> (out (B, c_in, T), kl scalar)."""
    bf16 = jnp.bfloat16
    T = x.shape[-1]

    # Boundary permutes only: kernel runs channels-last.
    x_tc = jnp.transpose(x, (0, 2, 1))          # (B, T, c_in)
    eps_tc = jnp.transpose(eps, (0, 2, 1))      # (B, T, hid)

    # Temporal shift matrices (built once, VMEM-resident across grid steps).
    sp = jnp.eye(T, k=-1, dtype=bf16)           # (S_prev @ x)[t] = x[t-1]
    sn = jnp.eye(T, k=1, dtype=bf16)            # (S_next @ x)[t] = x[t+1]

    # Weight prep: conv taps as (k, C_in, C_out); Linear weights pre-transposed,
    # mean/var heads fused along the output dim.
    ew = jnp.transpose(params["enc_w"], (2, 1, 0)).astype(bf16)   # (3, c_in, hid)
    dw = jnp.transpose(params["dec_w"], (2, 1, 0)).astype(bf16)   # (3, hid, c_in)
    mvw = jnp.concatenate([params["mean_w"].T, params["var_w"].T],
                          axis=1).astype(bf16)                    # (hid, 2*hid)
    mvb = jnp.concatenate([params["mean_b"], params["var_b"]]).reshape(1, -1)
    eb = params["enc_b"].reshape(1, -1)
    db = params["dec_b"].reshape(1, -1)

    out_tc, kl_parts = _fused_forward(x_tc, eps_tc, sp, sn, ew, eb, mvw, mvb, dw, db)

    out = jnp.transpose(out_tc, (0, 2, 1))      # back to (B, c_in, T)
    kl = -0.5 * jnp.mean(kl_parts)              # mean over batch of per-batch sums
    return out, kl


def init_params(key, c_in, hid):
    ks = jax.random.split(key, 8)

    def u(k, shape, fan_in):
        bound = 1.0 / (fan_in ** 0.5)
        return jax.random.uniform(k, shape, jnp.float32, -bound, bound)

    return {
        "enc_w": u(ks[0], (hid, c_in, 3), c_in * 3),
        "enc_b": u(ks[1], (hid,), c_in * 3),
        "dec_w": u(ks[2], (c_in, hid, 3), hid * 3),
        "dec_b": u(ks[3], (c_in,), hid * 3),
        "mean_w": u(ks[4], (hid, hid), hid),   # nn.Linear weight (out, in)
        "mean_b": u(ks[5], (hid,), hid),
        "var_w": u(ks[6], (hid, hid), hid),
        "var_b": u(ks[7], (hid,), hid),
    }


if __name__ == "__main__":
    key = jax.random.PRNGKey(0)
    B, C_IN, SEG_LEN, HID = 2, 16, 8, 32   # small shapes consistent with (c_in, seg_len, hid)
    kx, keps, kp = jax.random.split(key, 3)

    x = jax.random.normal(kx, (B, C_IN, SEG_LEN), jnp.float32)
    eps = jax.random.normal(keps, (B, HID, SEG_LEN), jnp.float32)  # torch.normal(0, 1)
    params = init_params(kp, C_IN, HID)

    out, kl = model_forward(params, x, eps)
    jax.block_until_ready((out, kl))

    assert out.shape == (B, C_IN, SEG_LEN)
    assert kl.shape == ()
    print("KERNEL_OK")
</pallas_src>

<mosaic_0001>
module attributes {stable_mosaic.version = 11 : i64} {
  func.func @_vae_fused_kernel(%arg0: i32, %arg1: memref<1x8x16xf32, #tpu.memory_space<vmem>>, %arg2: memref<1x8x32xf32, #tpu.memory_space<vmem>>, %arg3: memref<8x8xbf16, #tpu.memory_space<vmem>>, %arg4: memref<8x8xbf16, #tpu.memory_space<vmem>>, %arg5: memref<3x16x32xbf16, #tpu.memory_space<vmem>>, %arg6: memref<1x32xf32, #tpu.memory_space<vmem>>, %arg7: memref<32x64xbf16, #tpu.memory_space<vmem>>, %arg8: memref<1x64xf32, #tpu.memory_space<vmem>>, %arg9: memref<3x32x16xbf16, #tpu.memory_space<vmem>>, %arg10: memref<1x16xf32, #tpu.memory_space<vmem>>, %arg11: memref<1x8x16xf32, #tpu.memory_space<vmem>>, %arg12: memref<1x1x1xf32, #tpu.memory_space<vmem>>) attributes {dimension_semantics = [#tpu.dimension_semantics<parallel>], iteration_bounds = array<i64: 2>, scalar_prefetch = 0 : i64, scratch_operands = 0 : i64, tpu.core_type = #tpu.core_type<tc>, window_params = [{transform_indices = @transform_0, window_bounds = array<i64: 1, 8, 16>}, {transform_indices = @transform_1, window_bounds = array<i64: 1, 8, 32>}, {pipeline_mode = #tpu.pipeline_mode<synchronous>, transform_indices = @transform_2, window_bounds = array<i64: 8, 8>}, {pipeline_mode = #tpu.pipeline_mode<synchronous>, transform_indices = @transform_3, window_bounds = array<i64: 8, 8>}, {pipeline_mode = #tpu.pipeline_mode<synchronous>, transform_indices = @transform_4, window_bounds = array<i64: 3, 16, 32>}, {pipeline_mode = #tpu.pipeline_mode<synchronous>, transform_indices = @transform_5, window_bounds = array<i64: 1, 32>}, {pipeline_mode = #tpu.pipeline_mode<synchronous>, transform_indices = @transform_6, window_bounds = array<i64: 32, 64>}, {pipeline_mode = #tpu.pipeline_mode<synchronous>, transform_indices = @transform_7, window_bounds = array<i64: 1, 64>}, {pipeline_mode = #tpu.pipeline_mode<synchronous>, transform_indices = @transform_8, window_bounds = array<i64: 3, 32, 16>}, {pipeline_mode = #tpu.pipeline_mode<synchronous>, transform_indices = @transform_9, window_bounds = array<i64: 1, 16>}, {transform_indices = @transform_10, window_bounds = array<i64: 1, 8, 16>}, {transform_indices = @transform_11, window_bounds = array<i64: 1, 1, 1>}]} {
    %c0 = arith.constant 0 : index
    %c0_0 = arith.constant 0 : index
    %0 = vector.load %arg3[%c0, %c0_0] : memref<8x8xbf16, #tpu.memory_space<vmem>>, vector<8x8xbf16>
    %c0_1 = arith.constant 0 : index
    %c0_2 = arith.constant 0 : index
    %1 = vector.load %arg4[%c0_1, %c0_2] : memref<8x8xbf16, #tpu.memory_space<vmem>>, vector<8x8xbf16>
    %c0_3 = arith.constant 0 : index
    %c0_4 = arith.constant 0 : index
    %c0_5 = arith.constant 0 : index
    %2 = vector.load %arg1[%c0_3, %c0_4, %c0_5] : memref<1x8x16xf32, #tpu.memory_space<vmem>>, vector<1x8x16xf32>
    %3 = vector.shape_cast %2 : vector<1x8x16xf32> to vector<8x16xf32>
    %4 = arith.truncf %3 : vector<8x16xf32> to vector<8x16xbf16>
    %cst = arith.constant dense<0.000000e+00> : vector<8x16xf32>
    %5 = tpu.matmul %0, %4, %cst {dimension_numbers = #tpu.dot_dimension_numbers<[1], [0], [0], [1], [0, 0, 1, 1], [], []>} : vector<8x8xbf16>, vector<8x16xbf16>, vector<8x16xf32> -> vector<8x16xf32>
    %6 = arith.truncf %5 : vector<8x16xf32> to vector<8x16xbf16>
    %cst_6 = arith.constant dense<0.000000e+00> : vector<8x16xf32>
    %7 = tpu.matmul %1, %4, %cst_6 {dimension_numbers = #tpu.dot_dimension_numbers<[1], [0], [0], [1], [0, 0, 1, 1], [], []>} : vector<8x8xbf16>, vector<8x16xbf16>, vector<8x16xf32> -> vector<8x16xf32>
    %8 = arith.truncf %7 : vector<8x16xf32> to vector<8x16xbf16>
    %c0_7 = arith.constant 0 : index
    %c0_8 = arith.constant 0 : index
    %c0_9 = arith.constant 0 : index
    %9 = vector.load %arg5[%c0_7, %c0_8, %c0_9] : memref<3x16x32xbf16, #tpu.memory_space<vmem>>, vector<1x16x32xbf16>
    %10 = vector.shape_cast %9 : vector<1x16x32xbf16> to vector<16x32xbf16>
    %cst_10 = arith.constant dense<0.000000e+00> : vector<8x32xf32>
    %11 = tpu.matmul %6, %10, %cst_10 {dimension_numbers = #tpu.dot_dimension_numbers<[1], [0], [0], [1], [0, 0, 1, 1], [], []>} : vector<8x16xbf16>, vector<16x32xbf16>, vector<8x32xf32> -> vector<8x32xf32>
    %c1 = arith.constant 1 : index
    %c0_11 = arith.constant 0 : index
    %c0_12 = arith.constant 0 : index
    %12 = vector.load %arg5[%c1, %c0_11, %c0_12] : memref<3x16x32xbf16, #tpu.memory_space<vmem>>, vector<1x16x32xbf16>
    %13 = vector.shape_cast %12 : vector<1x16x32xbf16> to vector<16x32xbf16>
    %cst_13 = arith.constant dense<0.000000e+00> : vector<8x32xf32>
    %14 = tpu.matmul %4, %13, %cst_13 {dimension_numbers = #tpu.dot_dimension_numbers<[1], [0], [0], [1], [0, 0, 1, 1], [], []>} : vector<8x16xbf16>, vector<16x32xbf16>, vector<8x32xf32> -> vector<8x32xf32>
    %15 = arith.addf %11, %14 : vector<8x32xf32>
    %c2 = arith.constant 2 : index
    %c0_14 = arith.constant 0 : index
    %c0_15 = arith.constant 0 : index
    %16 = vector.load %arg5[%c2, %c0_14, %c0_15] : memref<3x16x32xbf16, #tpu.memory_space<vmem>>, vector<1x16x32xbf16>
    %17 = vector.shape_cast %16 : vector<1x16x32xbf16> to vector<16x32xbf16>
    %cst_16 = arith.constant dense<0.000000e+00> : vector<8x32xf32>
    %18 = tpu.matmul %8, %17, %cst_16 {dimension_numbers = #tpu.dot_dimension_numbers<[1], [0], [0], [1], [0, 0, 1, 1], [], []>} : vector<8x16xbf16>, vector<16x32xbf16>, vector<8x32xf32> -> vector<8x32xf32>
    %19 = arith.addf %15, %18 : vector<8x32xf32>
    %c0_17 = arith.constant 0 : index
    %c0_18 = arith.constant 0 : index
    %20 = vector.load %arg6[%c0_17, %c0_18] : memref<1x32xf32, #tpu.memory_space<vmem>>, vector<1x32xf32>
    %21 = vector.broadcast %20 : vector<1x32xf32> to vector<8x32xf32>
    %22 = arith.addf %19, %21 : vector<8x32xf32>
    %cst_19 = arith.constant 0.000000e+00 : f32
    %23 = vector.broadcast %cst_19 : f32 to vector<8x32xf32>
    %24 = arith.maximumf %22, %23 : vector<8x32xf32>
    %25 = arith.truncf %24 : vector<8x32xf32> to vector<8x32xbf16>
    %c0_20 = arith.constant 0 : index
    %c0_21 = arith.constant 0 : index
    %26 = vector.load %arg7[%c0_20, %c0_21] : memref<32x64xbf16, #tpu.memory_space<vmem>>, vector<32x64xbf16>
    %cst_22 = arith.constant dense<0.000000e+00> : vector<8x64xf32>
    %27 = tpu.matmul %25, %26, %cst_22 {dimension_numbers = #tpu.dot_dimension_numbers<[1], [0], [0], [1], [0, 0, 1, 1], [], []>} : vector<8x32xbf16>, vector<32x64xbf16>, vector<8x64xf32> -> vector<8x64xf32>
    %c0_23 = arith.constant 0 : index
    %c0_24 = arith.constant 0 : index
    %28 = vector.load %arg8[%c0_23, %c0_24] : memref<1x64xf32, #tpu.memory_space<vmem>>, vector<1x64xf32>
    %29 = vector.broadcast %28 : vector<1x64xf32> to vector<8x64xf32>
    %30 = arith.addf %27, %29 : vector<8x64xf32>
    %31 = vector.extract_strided_slice %30 {offsets = [0, 0], sizes = [8, 32], strides = [1, 1]} : vector<8x64xf32> to vector<8x32xf32>
    %32 = vector.extract_strided_slice %30 {offsets = [0, 32], sizes = [8, 32], strides = [1, 1]} : vector<8x64xf32> to vector<8x32xf32>
    %cst_25 = arith.constant 5.000000e-01 : f32
    %33 = vector.broadcast %cst_25 : f32 to vector<8x32xf32>
    %34 = arith.mulf %33, %32 : vector<8x32xf32>
    %35 = math.exp %34 : vector<8x32xf32>
    %c0_26 = arith.constant 0 : index
    %c0_27 = arith.constant 0 : index
    %c0_28 = arith.constant 0 : index
    %36 = vector.load %arg2[%c0_26, %c0_27, %c0_28] : memref<1x8x32xf32, #tpu.memory_space<vmem>>, vector<1x8x32xf32>
    %37 = vector.shape_cast %36 : vector<1x8x32xf32> to vector<8x32xf32>
    %38 = arith.mulf %35, %37 : vector<8x32xf32>
    %39 = arith.addf %31, %38 : vector<8x32xf32>
    %cst_29 = arith.constant 1.000000e+00 : f32
    %40 = vector.broadcast %cst_29 : f32 to vector<8x32xf32>
    %41 = arith.addf %40, %32 : vector<8x32xf32>
    %42 = arith.mulf %31, %31 : vector<8x32xf32>
    %43 = arith.subf %41, %42 : vector<8x32xf32>
    %44 = arith.mulf %35, %35 : vector<8x32xf32>
    %45 = arith.subf %43, %44 : vector<8x32xf32>
    %46 = vector.shape_cast %45 : vector<8x32xf32> to vector<1x8x32xf32>
    %cst_30 = arith.constant dense<0.000000e+00> : vector<1xf32>
    %47 = vector.multi_reduction <add>, %46, %cst_30 [1, 2] : vector<1x8x32xf32> to vector<1xf32>
    %48 = vector.shape_cast %47 : vector<1xf32> to vector<1x1x1xf32>
    %49 = vector.extract %48[0, 0, 0] : f32 from vector<1x1x1xf32>
    %50 = vector.broadcast %49 : f32 to vector<1x1xf32>
    %c0_31 = arith.constant 0 : index
    %c0_32 = arith.constant 0 : index
    %c0_33 = arith.constant 0 : index
    %51 = vector.load %arg12[%c0_31, %c0_32, %c0_33] : memref<1x1x1xf32, #tpu.memory_space<vmem>>, vector<1x1x1xf32>
    %52 = vector.shape_cast %51 : vector<1x1x1xf32> to vector<1x1xf32>
    %53 = vector.shape_cast %50 : vector<1x1xf32> to vector<1x1x1xf32>
    tpu.vector_store %arg12[%c0_31, %c0_32, %c0_33], %53 {strides = array<i32>} : memref<1x1x1xf32, #tpu.memory_space<vmem>>, vector<1x1x1xf32>,
    %54 = arith.truncf %39 : vector<8x32xf32> to vector<8x32xbf16>
    %cst_34 = arith.constant dense<0.000000e+00> : vector<8x32xf32>
    %55 = tpu.matmul %0, %54, %cst_34 {dimension_numbers = #tpu.dot_dimension_numbers<[1], [0], [0], [1], [0, 0, 1, 1], [], []>} : vector<8x8xbf16>, vector<8x32xbf16>, vector<8x32xf32> -> vector<8x32xf32>
    %56 = arith.truncf %55 : vector<8x32xf32> to vector<8x32xbf16>
    %cst_35 = arith.constant dense<0.000000e+00> : vector<8x32xf32>
    %57 = tpu.matmul %1, %54, %cst_35 {dimension_numbers = #tpu.dot_dimension_numbers<[1], [0], [0], [1], [0, 0, 1, 1], [], []>} : vector<8x8xbf16>, vector<8x32xbf16>, vector<8x32xf32> -> vector<8x32xf32>
    %58 = arith.truncf %57 : vector<8x32xf32> to vector<8x32xbf16>
    %c0_36 = arith.constant 0 : index
    %c0_37 = arith.constant 0 : index
    %c0_38 = arith.constant 0 : index
    %59 = vector.load %arg9[%c0_36, %c0_37, %c0_38] : memref<3x32x16xbf16, #tpu.memory_space<vmem>>, vector<1x32x16xbf16>
    %60 = vector.shape_cast %59 : vector<1x32x16xbf16> to vector<32x16xbf16>
    %cst_39 = arith.constant dense<0.000000e+00> : vector<8x16xf32>
    %61 = tpu.matmul %56, %60, %cst_39 {dimension_numbers = #tpu.dot_dimension_numbers<[1], [0], [0], [1], [0, 0, 1, 1], [], []>} : vector<8x32xbf16>, vector<32x16xbf16>, vector<8x16xf32> -> vector<8x16xf32>
    %c1_40 = arith.constant 1 : index
    %c0_41 = arith.constant 0 : index
    %c0_42 = arith.constant 0 : index
    %62 = vector.load %arg9[%c1_40, %c0_41, %c0_42] : memref<3x32x16xbf16, #tpu.memory_space<vmem>>, vector<1x32x16xbf16>
    %63 = vector.shape_cast %62 : vector<1x32x16xbf16> to vector<32x16xbf16>
    %cst_43 = arith.constant dense<0.000000e+00> : vector<8x16xf32>
    %64 = tpu.matmul %54, %63, %cst_43 {dimension_numbers = #tpu.dot_dimension_numbers<[1], [0], [0], [1], [0, 0, 1, 1], [], []>} : vector<8x32xbf16>, vector<32x16xbf16>, vector<8x16xf32> -> vector<8x16xf32>
    %65 = arith.addf %61, %64 : vector<8x16xf32>
    %c2_44 = arith.constant 2 : index
    %c0_45 = arith.constant 0 : index
    %c0_46 = arith.constant 0 : index
    %66 = vector.load %arg9[%c2_44, %c0_45, %c0_46] : memref<3x32x16xbf16, #tpu.memory_space<vmem>>, vector<1x32x16xbf16>
    %67 = vector.shape_cast %66 : vector<1x32x16xbf16> to vector<32x16xbf16>
    %cst_47 = arith.constant dense<0.000000e+00> : vector<8x16xf32>
    %68 = tpu.matmul %58, %67, %cst_47 {dimension_numbers = #tpu.dot_dimension_numbers<[1], [0], [0], [1], [0, 0, 1, 1], [], []>} : vector<8x32xbf16>, vector<32x16xbf16>, vector<8x16xf32> -> vector<8x16xf32>
    %69 = arith.addf %65, %68 : vector<8x16xf32>
    %c0_48 = arith.constant 0 : index
    %c0_49 = arith.constant 0 : index
    %70 = vector.load %arg10[%c0_48, %c0_49] : memref<1x16xf32, #tpu.memory_space<vmem>>, vector<1x16xf32>
    %71 = vector.broadcast %70 : vector<1x16xf32> to vector<8x16xf32>
    %72 = arith.addf %69, %71 : vector<8x16xf32>
    %c0_50 = arith.constant 0 : index
    %c0_51 = arith.constant 0 : index
    %c0_52 = arith.constant 0 : index
    %73 = vector.load %arg11[%c0_50, %c0_51, %c0_52] : memref<1x8x16xf32, #tpu.memory_space<vmem>>, vector<1x8x16xf32>
    %74 = vector.shape_cast %73 : vector<1x8x16xf32> to vector<8x16xf32>
    %75 = vector.shape_cast %72 : vector<8x16xf32> to vector<1x8x16xf32>
    tpu.vector_store %arg11[%c0_50, %c0_51, %c0_52], %75 {strides = array<i32>} : memref<1x8x16xf32, #tpu.memory_space<vmem>>, vector<1x8x16xf32>,
    return
  }
  func.func @transform_0(%arg0: i32) -> (i32, i32, i32) {
    %c0_i32 = arith.constant 0 : i32
    %c0_i32_0 = arith.constant 0 : i32
    %c0_i32_1 = arith.constant 0 : i32
    return %arg0, %c0_i32, %c0_i32_0 : i32, i32, i32
  }
  func.func @transform_1(%arg0: i32) -> (i32, i32, i32) {
    %c0_i32 = arith.constant 0 : i32
    %c0_i32_0 = arith.constant 0 : i32
    %c0_i32_1 = arith.constant 0 : i32
    return %arg0, %c0_i32, %c0_i32_0 : i32, i32, i32
  }
  func.func @transform_2(%arg0: i32) -> (i32, i32) {
    %c0_i32 = arith.constant 0 : i32
    %c0_i32_0 = arith.constant 0 : i32
    %c0_i32_1 = arith.constant 0 : i32
    return %c0_i32, %c0_i32_0 : i32, i32
  }
  func.func @transform_3(%arg0: i32) -> (i32, i32) {
    %c0_i32 = arith.constant 0 : i32
    %c0_i32_0 = arith.constant 0 : i32
    %c0_i32_1 = arith.constant 0 : i32
    return %c0_i32, %c0_i32_0 : i32, i32
  }
  func.func @transform_4(%arg0: i32) -> (i32, i32, i32) {
    %c0_i32 = arith.constant 0 : i32
    %c0_i32_0 = arith.constant 0 : i32
    %c0_i32_1 = arith.constant 0 : i32
    %c0_i32_2 = arith.constant 0 : i32
    return %c0_i32, %c0_i32_0, %c0_i32_1 : i32, i32, i32
  }
  func.func @transform_5(%arg0: i32) -> (i32, i32) {
    %c0_i32 = arith.constant 0 : i32
    %c0_i32_0 = arith.constant 0 : i32
    %c0_i32_1 = arith.constant 0 : i32
    return %c0_i32, %c0_i32_0 : i32, i32
  }
  func.func @transform_6(%arg0: i32) -> (i32, i32) {
    %c0_i32 = arith.constant 0 : i32
    %c0_i32_0 = arith.constant 0 : i32
    %c0_i32_1 = arith.constant 0 : i32
    return %c0_i32, %c0_i32_0 : i32, i32
  }
  func.func @transform_7(%arg0: i32) -> (i32, i32) {
    %c0_i32 = arith.constant 0 : i32
    %c0_i32_0 = arith.constant 0 : i32
    %c0_i32_1 = arith.constant 0 : i32
    return %c0_i32, %c0_i32_0 : i32, i32
  }
  func.func @transform_8(%arg0: i32) -> (i32, i32, i32) {
    %c0_i32 = arith.constant 0 : i32
    %c0_i32_0 = arith.constant 0 : i32
    %c0_i32_1 = arith.constant 0 : i32
    %c0_i32_2 = arith.constant 0 : i32
    return %c0_i32, %c0_i32_0, %c0_i32_1 : i32, i32, i32
  }
  func.func @transform_9(%arg0: i32) -> (i32, i32) {
    %c0_i32 = arith.constant 0 : i32
    %c0_i32_0 = arith.constant 0 : i32
    %c0_i32_1 = arith.constant 0 : i32
    return %c0_i32, %c0_i32_0 : i32, i32
  }
  func.func @transform_10(%arg0: i32) -> (i32, i32, i32) {
    %c0_i32 = arith.constant 0 : i32
    %c0_i32_0 = arith.constant 0 : i32
    %c0_i32_1 = arith.constant 0 : i32
    return %arg0, %c0_i32, %c0_i32_0 : i32, i32, i32
  }
  func.func @transform_11(%arg0: i32) -> (i32, i32, i32) {
    %c0_i32 = arith.constant 0 : i32
    %c0_i32_0 = arith.constant 0 : i32
    %c0_i32_1 = arith.constant 0 : i32
    return %arg0, %c0_i32, %c0_i32_0 : i32, i32, i32
  }
}

</mosaic_0001>

<bundles_post_ra>
// kernel: model_forward.1
= control target key start
LH: loop header
LB: loop body
LE: loop exit
PB: predicated region body
PF: predicated region fallthrough
CT: control target
= control target key end

     0   :  { %s1717_s0 = inlined_call_operand.vmem [shape: f32[2,8,16], index: 0, kind: input, shape index: {}]   ;;  %s1718_s1 = inlined_call_operand.vmem [shape: f32[2,8,32], index: 1, kind: input, shape index: {}]   ;;  %s1719_s2 = inlined_call_operand.vmem [shape: bf16[8,8], index: 2, kind: input, shape index: {}]   ;;  %s1720_s3 = inlined_call_operand.vmem [shape: bf16[8,8], index: 3, kind: input, shape index: {}]   ;;  %s1721_s4 = inlined_call_operand.vmem [shape: bf16[3,16,32], index: 4, kind: input, shape index: {}]   ;;  %s1722_s5 = inlined_call_operand.vmem [shape: f32[1,32], index: 5, kind: input, shape index: {}]   ;;  %s1723_s6 = inlined_call_operand.vmem [shape: bf16[32,64], index: 6, kind: input, shape index: {}]   ;;  %s1724_s7 = inlined_call_operand.vmem [shape: f32[1,64], index: 7, kind: input, shape index: {}]   ;;  %s1725_s8 = inlined_call_operand.vmem [shape: bf16[3,32,16], index: 8, kind: input, shape index: {}]   ;;  %s1726_s9 = inlined_call_operand.vmem [shape: f32[1,16], index: 9, kind: input, shape index: {}]   ;;  %s1727_s10 = inlined_call_operand.hbm [shape: f32[2,8,16], index: 10, kind: output, shape index: {0}]   ;;  %s1728_s11 = inlined_call_operand.vmem [shape: f32[2,1,1], index: 11, kind: output, shape index: {1}]  }
   0x1   :  { %1729 = sst [smem:[#allocation5_spill]] %s1717_s0 }
   0x2   :  { %17 = vsyncpa [#allocation3], 0 }
   0x3   :  { %19 = vsyncpa [#allocation3 + $0x1], 0  ;;  %s1496_s17 = smov 0   ;;  %s1498_s18 = smov 0  }
   0x4   :  { %s1500_s19 = smov 0   ;;  %s1502_s20 = smov 0  }
   0x5 LB: > { %s1517_s21 = sadd.s32 4294967295, %s1429_s20   ;;  %s1163_s22 = sadd.s32 4294967294, %s1429_s20   ;;  %s1429_s20 = sphi %s1502_s20, %s1736_s20   ;;  %s1425_s19 = sphi %s1500_s19, %s1735_s19   ;;  %s1421_s18 = sphi %s1498_s18, %s1734_s18   ;;  %s1417_s17 = sphi %s1496_s17, %s1733_s17  }
   0x6   : > { %s1521_s23 = sadd.s32 1, %s1429_s20   ;;  %s252_s24 = sadd.s32 1, %s1425_s19 }
   0x7   : > { %s249_s25 = ssub.s32 %s1429_s20, %s1521_s23  ;;  %p262_p0 = scmp.ne.s32.totalorder %s1425_s19, %s1421_s18 }
   0x8   : > { %p250_p1 = scmp.eq.s32.totalorder %s249_s25, 0  ;;  %p263_p2 = scmp.eq.s32.totalorder %s1517_s21, 1 }
   0x9   : > { %p268_p3 = scmp.ne.s32.totalorder %s1421_s18, %s1417_s17  ;;  %p269_p4 = scmp.eq.s32.totalorder %s1163_s22, 1 }
   0xa   : > { %s1532_s26 = scalar_select %p250_p1, %s1425_s19, %s252_s24  }
   0xb   : > { %p1534_p5 = por %p263_p2, %p262_p0  ;;  %p1538_p6 = por %p269_p4, %p268_p3 }
   0xc   : > { %p1166_p7 = scmp.ge.s32.totalorder %s1429_s20, 1  ;;  %p351_p8 = scmp.lt.s32.totalorder %s1429_s20, 3 }
   0xe   : > { %p352_p9 = pnand %p1166_p7, %p351_p8 }
   0xf   : > { %p397_p10 = scmp.lt.s32.totalorder (!%p352_p9), %s1517_s21, 1  ;;  %s1732_s0 = sld [smem:[#allocation5_spill]] (!%p352_p9) }
  0x10   : > { %355 = sbr.rel (%p352_p9) target bundleno = 1175 (0x497), region = 60  ;;  %s1433_s16 = smov (!%p352_p9), 32  }
  0x11   : > { %s1434_s12 = smov (!%p352_p9), 96   ;;  %s389_s25 = sand.u32 (!%p352_p9), 1, %s1421_s18  }
  0x15   : > { %v1431_v0 = vmov 0.0   ;;  %s1548_s29 = scalar_select %p397_p10, %s1517_s21, 1  ;;  %vm1432_vm0 = vmmov 0   ;;  %vm417_vm1 = vcmask 1043456   ;;  %v1563_v3 = vld [vmem:[%s1719_s2] sm:$0xf] }
  0x16   : > { %1237 = vmatprep.subr.bf16.mxu0 %v1431_v0  ;;  %1243 = vmatprep.subr.bf16.mxu1 %v1431_v0  ;;  %vm413_vm2 = vcmask 64512   ;;  %v1569_v5 = vld [vmem:[%s1720_s3] sm:$0xf]  ;;  %v1356_v6 = vld [vmem:[%s1721_s4 + $0x8] sm:$0xff]   ;;  %vm517_vm3 = vcmask 130048   ;;  %v1358_v8 = vld [vmem:[%s1721_s4 + $0x10] sm:$0xff]  }
  0x17   : > { %1239 = vmatprep.mubr.msk.bf16.mxu0 %vm1432_vm0, %v1431_v0  ;;  %1245 = vmatprep.mubr.msk.bf16.mxu1 %vm1432_vm0, %v1431_v0  ;;  %s1168_s30 = sshll.u32 %s1548_s29, 3  ;;  %v1357_v7 = vld [vmem:[%s1721_s4] sm:$0xff]   ;;  %v1359_v23 = vld [vmem:[%s1723_s6 + $0x8] sm:$0xff]   ;;  %vm695_vm4 = vcmask 261120   ;;  %v1361_v61 = vld [vmem:[%s1725_s8 + $0x18] sm:$0xff]   ;;  %s407_s24 = scalar_lea.vmem %s1728_s11, %s1548_s29  ;;  %vm777_vm5 = vcmask 0  }
  0x18   : > { %s400_s14 = scalar_lea.vmem %s1732_s0, %s1168_s30  ;;  %v1360_v24 = vld [vmem:[%s1723_s6] sm:$0xff]   ;;  %s404_s15 = scalar_lea.vmem %s1718_s1, %s1168_s30  ;;  %v1363_v62 = vld [vmem:[%s1725_s8 + $0x8] sm:$0xff]   ;;  %v1362_v63 = vld [vmem:[%s1725_s8 + $0x10] sm:$0xff]  }
  0x19   : > { %v411_v1 = vld [vmem:[%s400_s14] sm:$0xff] }
  0x1a   : > { %v412_v2 = vpack.c.bf16 %v411_v1, %v411_v1  ;;  %v742_v25 = vld [vmem:[%s404_s15] sm:$0xff]  ;;  %v1364_v1 = vld [vmem:[%s1725_s8 + $0x28] sm:$0xff]   ;;  %s1208_s15 = sshll.u32 %s1517_s21, 7  ;;  %s1054_s21 = scalar_lea.sflag [#allocation3], %s389_s25 }
  0x1b   : > { %744 = vrot.lane.b32.xlu0 %v742_v25, %s1433_s16  ;;  %v1182_v29 = vld [vmem:[%s1722_s5] ss:$0 sm:$0xff] }
  0x1c   : > { %v419_v4 = vsel %vm417_vm1, %v412_v2, 0  ;;  %v1183_v40 = vld [vmem:[%s1724_s7] ss:$0 sm:$0xff] }
  0x1d   : > { %1238 = vmatpush3.bf16.msra.mxu0 %v419_v4  ;;  %1244 = vmatpush3.bf16.msra.mxu1 %v419_v4 }
  0x1e   : > { %1249 = vmatprep.subr.bf16.mxu0 %v1431_v0  ;;  %1255 = vmatprep.subr.bf16.mxu1 %v1431_v0 }
  0x20   : > { %1240 = vmatmul.mubr.msk.bf16.vlgmr.msra.gmra.mxu0 %vm413_vm2, %v1563_v3  ;;  %1246 = vmatmul.mubr.msk.bf16.vlgmr.msra.gmra.mxu1 %vm413_vm2, %v1569_v5 }
  0x21   : > { %1250 = vmatpush3.bf16.msra.mxu0 %v1356_v6  ;;  %1251 = vmatprep.mubr.msk.bf16.mxu0 %vm1432_vm0, %v1431_v0 }
  0x22   : > { %1261 = vmatprep.subr.bf16.mxu0 %v1431_v0  ;;  %1257 = vmatprep.mubr.msk.bf16.mxu1 %vm1432_vm0, %v1431_v0 }
  0x23   : > { %1256 = vmatpush3.bf16.msra.mxu1 %v1357_v7 }
  0x24   : > { %1267 = vmatprep.subr.bf16.mxu1 %v1431_v0 }
  0x28   : > { %1252 = vmatmul.mubr.msk.bf16.vlgmr.msra.gmra.mxu0 %vm517_vm3, %v412_v2  ;;  %v1365_v2 = vld [vmem:[%s1725_s8] sm:$0xff]  }
  0x29   : > { %1263 = vmatprep.mubr.msk.bf16.mxu0 %vm1432_vm0, %v1431_v0  ;;  %1262 = vmatpush3.bf16.msra.mxu0 %v1358_v8 }
  0x2a   : > { %1275 = vmatprep.subr.bf16.mxu0 %v1431_v0 }
  0x8d   : > { %v745_v49 = vpop.permute.xlu0 %744 }
  0xe0   : > { %v455_v9 = vpop.f32.mrf.mxu0  ;;  %v499_v10 = vpop.f32.mrf.mxu1 }
  0xe1   : > { %v461_v11 = vpack.c.bf16 %v455_v9, %v455_v9  ;;  %v505_v12 = vpack.c.bf16 %v499_v10, %v499_v10 }
  0xe2   : > { %v1241_v13 = vpop.f32.mrf.mxu0  ;;  %v1247_v14 = vpop.f32.mrf.mxu1 }
  0xe3   : > { %1258 = vmatmul.mubr.msk.bf16.vlgmr.msra.gmra.mxu1 %vm517_vm3, %v461_v11  ;;  %1264 = vmatmul.mubr.msk.bf16.vlgmr.msra.gmra.mxu0 %vm517_vm3, %v505_v12 }
  0xe4   : > { %v458_v15 = vpop.f32.mrf.mxu0  ;;  %v502_v16 = vpop.f32.mrf.mxu1  ;;  %1271 = vmatprep.mubr.msk.bf16.mxu1 %vm1432_vm0, %v1431_v0  ;;  %1277 = vmatprep.mubr.msk.bf16.mxu0 %vm1432_vm0, %v1431_v0 }
  0xe5   : > { %1268 = vmatpush3.bf16.msra.mxu1 %v1359_v23 }
  0xe6   : > { %v1242_v17 = vpop.f32.mrf.mxu0  ;;  %v1248_v18 = vpop.f32.mrf.mxu1  ;;  %1269 = vmatprep.subr.bf16.mxu1 %v1431_v0 }
  0xe8   : > { %v554_v19 = vpop.f32.mrf.mxu0 }
  0xe9   : > { %1270 = vmatpush3.bf16.msra.mxu1 %v1360_v24 }
  0xea   : > { %v1253_v20 = vpop.f32.mrf.mxu0  ;;  %1281 = vmatprep.subr.bf16.mxu1 %v1431_v0 }
  0xec   : > { %v557_v21 = vpop.f32.mrf.mxu0 }
  0xee   : > { %v1254_v22 = vpop.f32.mrf.mxu0 }
 0x1a3   : > { %v603_v26 = vpop.f32.mrf.mxu1  ;;  %v655_v27 = vpop.f32.mrf.mxu0 }
 0x1a4   : > { %v604_v28 = vadd.f32 %v603_v26, %v554_v19 }
 0x1a5   : > { %v1259_v30 = vpop.f32.mrf.mxu1  ;;  %v1265_v31 = vpop.f32.mrf.mxu0 }
 0x1a6   : > { %v661_v32 = vadd.f32 %v655_v27, %v604_v28  ;;  %v1206_v30 = vld [vmem:[%s1726_s9] ss:$0 sm:$0xff] }
 0x1a7   : > { %v606_v33 = vpop.f32.mrf.mxu1  ;;  %v658_v34 = vpop.f32.mrf.mxu0 }
 0x1a8   : > { %v669_v35 = vadd.f32 %v1182_v29, %v661_v32 }
 0x1a9   : > { %v1260_v36 = vpop.f32.mrf.mxu1  ;;  %v1266_v37 = vpop.f32.mrf.mxu0 }
 0x1aa   : > { %v670_v38 = vmax.f32 %v669_v35, 0.0 }
 0x1ac   : > { %v671_v39 = vpack.c.bf16 %v670_v38, %v670_v38 }
 0x1ae   : > { %1272 = vmatmul.mubr.msk.bf16.vlgmr.msra.gmra.mxu1 %vm695_vm4, %v671_v39 }
 0x1af   : > { %1283 = vmatprep.mubr.msk.bf16.mxu1 %vm1432_vm0, %v1431_v0 }
 0x26e   : > { %v733_v41 = vpop.f32.mrf.mxu1 }
 0x26f   : > { %v734_v42 = vadd.f32 %v1183_v40, %v733_v41 }
 0x270   : > { %v1273_v43 = vpop.f32.mrf.mxu1 }
 0x271   : > { %v739_v44 = vmul.f32 0.5, %v734_v42  ;;  %v754_v45 = vmul.f32 %v734_v42, %v734_v42  ;;  %v753_v52 = vadd.f32 1.0, %v734_v42 }
 0x272   : > { %v736_v46 = vpop.f32.mrf.mxu1 }
 0x273   : > { %v740_v47 = vmul.f32 1.442695, %v739_v44  ;;  %756 = vrot.lane.b32.xlu1 %v754_v45, %s1433_s16 }
 0x274   : > { %v1274_v48 = vpop.f32.mrf.mxu1 }
 0x275   : > { %1367 = vpow2.f32 %v740_v47 }
 0x282   : > { %v1368_v50 = vpop.eup %1367 }
 0x283   : > { %v747_v51 = vmul.f32 %v1368_v50, %v745_v49  ;;  %v760_v55 = vmul.f32 %v1368_v50, %v1368_v50 }
 0x285   : > { %749 = vrot.lane.b32.xlu0 %v747_v51, %s1434_s12 }
 0x2e5   : > { %v757_v53 = vpop.permute.xlu1 %756 }
 0x2e6   : > { %v759_v54 = vsub.f32 %v753_v52, %v757_v53 }
 0x2e8   : > { %v761_v56 = vsub.f32 %v759_v54, %v760_v55 }
 0x2ea   : > { %763 = vrot.lane.b32.xlu1 %v761_v56, %s1434_s12  ;;  %s1167_s12 = sshll.u32 %s389_s25, 3 }
 0x2eb   : > { %s391_s0 = scalar_lea.vmem [#allocation2], %s1167_s12  ;;  %s1435_s12 = smov [#allocation2]  }
 0x2ec   : > { %s1070_s16 = sshll.u32 %s391_s0, 4  ;;  %s1373_s13 = sshll.u32 %s1435_s12, 4  ;;  %s1677_s16 = int_to_ptr.vmem [resolvable:$true] %s1070_s16  ;;  %s1374_s13 = int_to_ptr.vmem [resolvable:$false] %s1373_s13 }
 0x2ed   : > { %s1375_s14 = scalar_lea.vmem %s1374_s13, 256  ;;  %p1376_p0 = scmp.lt.s32.totalorder %s1677_s16, %s1374_s13 }
 0x2f7   : > { %v750_v57 = vpop.permute.xlu0 %749 }
 0x2f8   : > { %v752_v58 = vadd.f32 %v750_v57, %v734_v42 }
 0x2fa   : > { %v779_v59 = vpack.c.bf16 %v752_v58, %v752_v58 }
 0x2fc   : > { %v781_v60 = vsel %vm417_vm1, %v779_v59, 0 }
 0x2fd   : > { %1276 = vmatpush3.bf16.msra.mxu0 %v781_v60  ;;  %1282 = vmatpush3.bf16.msra.mxu1 %v781_v60 }
 0x2fe   : > { %1287 = vmatprep.subr.bf16.mxu0 %v1431_v0  ;;  %1295 = vmatprep.subr.bf16.mxu1 %v1431_v0 }
 0x300   : > { %1278 = vmatmul.mubr.msk.bf16.vlgmr.msra.gmra.mxu0 %vm413_vm2, %v1563_v3  ;;  %1284 = vmatmul.mubr.msk.bf16.vlgmr.msra.gmra.mxu1 %vm413_vm2, %v1569_v5  ;;  %v1366_v3 = vld [vmem:[%s1725_s8 + $0x20] sm:$0xff]  }
 0x301   : > { %1288 = vmatpush3.bf16.msra.mxu0 %v1361_v61  ;;  %1291 = vmatprep.mubr.msk.bf16.mxu0 %vm1432_vm0, %v1431_v0 }
 0x302   : > { %1289 = vmatprep.subr.bf16.mxu0 %v1431_v0  ;;  %1296 = vmatpush3.bf16.msra.mxu1 %v1363_v62 }
 0x303   : > { %1297 = vmatprep.subr.bf16.mxu1 %v1431_v0  ;;  %1299 = vmatprep.mubr.msk.bf16.mxu1 %vm1432_vm0, %v1431_v0 }
 0x305   : > { %1290 = vmatpush3.bf16.msra.mxu0 %v1362_v63 }
 0x306   : > { %1303 = vmatprep.subr.bf16.mxu0 %v1431_v0  ;;  %1298 = vmatpush3.bf16.msra.mxu1 %v1365_v2 }
 0x308   : > { %1292 = vmatmul.mubr.msk.bf16.vlgmr.msra.gmra.mxu0 %vm695_vm4, %v779_v59 }
 0x309   : > { %1304 = vmatpush3.bf16.msra.mxu0 %v1364_v1  ;;  %1307 = vmatprep.mubr.msk.bf16.mxu0 %vm1432_vm0, %v1431_v0 }
 0x30a   : > { %1305 = vmatprep.subr.bf16.mxu0 %v1431_v0 }
 0x30d   : > { %1306 = vmatpush3.bf16.msra.mxu0 %v1366_v3 }
 0x35c   : > { %v764_v4 = vpop.permute.xlu1 %763 }
 0x35d   : > { %v766_v5 = vsel %vm695_vm4, %v764_v4, 0.0 }
 0x35e   : > { %767 = vadd.xlane.f32.xlu0 %v766_v5 }
 0x3c0   : > { %v817_v6 = vpop.f32.mrf.mxu0  ;;  %v858_v7 = vpop.f32.mrf.mxu1 }
 0x3c1   : > { %v823_v8 = vpack.c.bf16 %v817_v6, %v817_v6  ;;  %v864_v9 = vpack.c.bf16 %v858_v7, %v858_v7 }
 0x3c2   : > { %v1279_v10 = vpop.f32.mrf.mxu0  ;;  %v1285_v0 = vpop.f32.mrf.mxu1 }
 0x3c3   : > { %1300 = vmatmul.mubr.msk.bf16.vlgmr.msra.gmra.mxu1 %vm695_vm4, %v823_v8  ;;  %1308 = vmatmul.mubr.msk.bf16.vlgmr.msra.gmra.mxu0 %vm695_vm4, %v864_v9 }
 0x3c4   : > { %v820_v11 = vpop.f32.mrf.mxu0  ;;  %v861_v12 = vpop.f32.mrf.mxu1 }
 0x3c6   : > { %v1280_v13 = vpop.f32.mrf.mxu0  ;;  %v1286_v14 = vpop.f32.mrf.mxu1 }
 0x3c8   : > { %v922_v15 = vpop.f32.mrf.mxu0 }
 0x3ca   : > { %v1293_v16 = vpop.f32.mrf.mxu0 }
 0x3cc   : > { %v925_v17 = vpop.f32.mrf.mxu0 }
 0x3ce   : > { %v1294_v18 = vpop.f32.mrf.mxu0 }
 0x3e7   : > { %v768_v19 = vpop.xlane.xlu0 %767 }
 0x3e8   : > { %v769_v20 = vrot.slane %v768_v19, 4 }
 0x3ea   : > { %v770_v21 = vadd.f32 %v769_v20, %v768_v19 }
 0x3ec   : > { %v771_v22 = vrot.slane %v770_v21, 2 }
 0x3ee   : > { %v772_v23 = vadd.f32 %v771_v22, %v770_v21 }
 0x3f0   : > { %v773_v24 = vrot.slane %v772_v23, 1 }
 0x3f2   : > { %v774_v25 = vadd.f32 %v773_v24, %v772_v23 }
 0x3f4   : > { %1311 = vpush %v774_v25 }
 0x425   : > { %s1312_s30 = spop %1311 }
 0x426   : > { %v776_v26 = vstv %s1312_s30  ;;  %s1369_s30 = scalar_lea.vmem %s1677_s16, 128 }
 0x427   : > { %778 = vst.msk [vmem:[%s407_s24] sm:$0x1] %vm777_vm5, %v776_v26  ;;  %s1675_s24 = scalar_lea.hbm %s1727_s10, %s1208_s15  ;;  %p1370_p11 = scmp.ne.s32.totalorder %s1677_s16, %s1369_s30 }
 0x428   : > { %p1377_p1 = scmp.lt.s32.totalorder %s1375_s14, %s1369_s30 }
 0x429   : > { %p1371_p12 = pnand %p1370_p11, %p1534_p5 }
 0x42a   : > { %p1378_p2 = por %p1377_p1, %p1376_p0 }
 0x42b   : > { %p1372_p13 = pneg %p1371_p12 }
 0x42d   : > { %p1379_p3 = pnand %p1378_p2, %p1372_p13 }
 0x483   : > { %v977_v27 = vpop.f32.mrf.mxu1  ;;  %v1037_v28 = vpop.f32.mrf.mxu0 }
 0x484   : > { %v978_v29 = vadd.f32 %v977_v27, %v922_v15 }
 0x485   : > { %v1301_v31 = vpop.f32.mrf.mxu1  ;;  %v1309_v32 = vpop.f32.mrf.mxu0 }
 0x486   : > { %v1043_v33 = vadd.f32 %v1037_v28, %v978_v29 }
 0x487   : > { %v980_v34 = vpop.f32.mrf.mxu1  ;;  %v1040_v35 = vpop.f32.mrf.mxu0 }
 0x488   : > { %v1051_v36 = vadd.f32 %v1206_v30, %v1043_v33 }
 0x489   : > { %v1302_v37 = vpop.f32.mrf.mxu1  ;;  %v1310_v38 = vpop.f32.mrf.mxu0 }
 0x48a   : > { %1052 = vst.msk [vmem:[%s391_s0] sm:$0xff] %vm517_vm3, %v1051_v36 }
 0x48b   : > { %1382 = shalt.err (!%p1379_p3)
}
 0x48c   : > { %s1383_s0 = scalar_lea.hbm %s1675_s24, 128  ;;  %s1387_s29 = scalar_lea.hbm %s1727_s10, 256 }
 0x48d   : > { %p1384_p4 = scmp.ne.s32.totalorder %s1675_s24, %s1383_s0  ;;  %p1388_p9 = scmp.lt.s32.totalorder %s1675_s24, %s1727_s10 }
 0x48e   : > { %p1389_p10 = scmp.lt.s32.totalorder %s1387_s29, %s1383_s0 }
 0x48f   : > { %p1385_p7 = pnand %p1384_p4, %p1534_p5 }
 0x490   : > { %p1390_p11 = por %p1389_p10, %p1388_p9 }
 0x491   : > { %p1386_p8 = pneg %p1385_p7 }
 0x493   : > { %p1391_p12 = pnand %p1390_p11, %p1386_p8 }
 0x495   : > { %1394 = shalt.err (!%p1391_p12)
}
 0x496   : > { %1313 = dma.vmem_to_hbm [thread:$0]  (%p1534_p5), %s1677_s16, 128, %s1675_s24, %s1054_s21  }
 0x497 PF: > { %p1319_p13 = scmp.ge.s32.totalorder %s1429_s20, 2  ;;  %s1085_s30 = sand.u32 1, %s1417_s17  }
 0x498   : > { %s1086_s13 = scalar_lea.sflag [#allocation3], %s1085_s30 }
 0x499   : > { %p1316_p0 = pnand %p1319_p13, %p1538_p6 }
 0x49b   : > { %p1317_p1 = pneg %p1316_p0 }
 0x49d   : > { %1412 = dma.done.wait (%p1317_p1), %s1086_s13, 128  }
 0x49e   : > { %1414 = vsyncadd (%p1317_p1), %s1086_s13, 4294967168  ;;  %p22_p2 = scmp.ge.s32.totalorder %s1521_s23, 4   ;;  %s1733_s17 = smov %s1421_s18 }
 0x49f   : > { %s1734_s18 = smov %s1425_s19  ;;  %s1735_s19 = smov %s1532_s26 }
 0x4a0   : > { %s1736_s20 = smov %s1521_s23  ;;  %24 = sbr.rel (!%p22_p2) target bundleno = 5 (0x5), region = 114 }
 0x4a5   :  { %1097 = vsyncpa [#allocation3], 1 }
 0x4a6   :  { %1099 = vsyncpa [#allocation3 + $0x1], 1 }

</bundles_post_ra>
